<compile_context>
chip_gen: v7x
topology: tpu7x:2x2x1
jax: 0.10.0
libtpu: 0.0.40
codegen_flags: <defaults>
</compile_context>

<pallas_src>
import jax
import jax.numpy as jnp
from jax.experimental import pallas as pl
from jax.experimental.pallas import tpu as pltpu


def _round_up(x, m):
    return ((x + m - 1) // m) * m


def _tpu_budget():
    """Return (vmem_limit_bytes, max_row_tile) tuned per TPU generation."""
    try:
        kind = jax.devices()[0].device_kind.lower()
    except Exception:  # defensive: assume a mid-size chip
        kind = ""
    if "v7" in kind or "7x" in kind:
        # v7x: 64 MiB physical VMEM per TensorCore -> conservative scoped limit
        # and row-tile cap so double-buffered weights + activations still fit.
        return 32 * 1024 * 1024, 512
    # v5e / v6e: 128 MiB physical VMEM -> larger limit and row tile so the
    # ~0.35 us/step pipeline overhead is amortised over more rows.
    return 64 * 1024 * 1024, 1024


def _choose_row_tile(M, S, E, H, AQ, vmem_limit_bytes, tm_cap):
    """Largest row tile (multiple of 16, >=16) whose VMEM footprint fits.

    Budgets 2x copies of the resident weights: the default pipeline reserves
    double buffers even for constant-index blocks (v7x review note).
    """
    weight_bytes = 2 * (2 * (E * S + S * H + H * H + H * AQ)      # bf16 weights
                        + 4 * (E + S + 2 * H + AQ))               # f32 pis + biases
    per_row_bytes = (2 * 4 * (1 + S + AQ)                         # streamed taus/state/Z, 2 buffers
                     + 6 * (E + S + 2 * H + AQ))                  # in-kernel f32 + bf16 intermediates
    budget = int(0.6 * vmem_limit_bytes) - weight_bytes
    rows = max(budget, 0) // max(per_row_bytes, 1)
    tm = max(16, min(tm_cap, (rows // 16) * 16))
    # Never larger than the (16-row padded) problem itself.
    return min(tm, _round_up(M, 16))


def iqn_kernel(taus_ref, state_ref, pis_ref,
               wc_ref, bc_ref,
               w1_ref, b1_ref,
               w2_ref, b2_ref,
               wz_ref, bz_ref,
               z_ref):
    # cosine embedding: cos(tau * pi * k), k = 1..E (true E columns only)
    cos = jnp.cos(taus_ref[...] * pis_ref[...])                    # (TM, E)

    # cosine_net: Linear(E -> S) + ReLU
    cos_x = jnp.dot(cos.astype(jnp.bfloat16), wc_ref[...],
                    preferred_element_type=jnp.float32)
    cos_x = jnp.maximum(cos_x + bc_ref[...], 0.0)                  # (TM, S)

    # elementwise modulation by the (pre-broadcast) per-row state
    x = state_ref[...] * cos_x                                     # (TM, S)

    # layer1: Linear(S -> H) + ReLU
    x = jnp.dot(x.astype(jnp.bfloat16), w1_ref[...],
                preferred_element_type=jnp.float32)
    x = jnp.maximum(x + b1_ref[...], 0.0)                          # (TM, H)

    # layer2: Linear(H -> H) + ReLU
    x = jnp.dot(x.astype(jnp.bfloat16), w2_ref[...],
                preferred_element_type=jnp.float32)
    x = jnp.maximum(x + b2_ref[...], 0.0)                          # (TM, H)

    # Z_value: Linear(H -> A*Q)
    z = jnp.dot(x.astype(jnp.bfloat16), wz_ref[...],
                preferred_element_type=jnp.float32)
    z_ref[...] = z + bz_ref[...]                                   # (TM, AQ)


def iqn_forward(state, taus, params, *, action_dim, quantile_len):
    """state: (B, S) f32, taus: (B, T, 1) f32 -> Z: (B, T, action_dim, quantile_len)."""
    B, S = state.shape
    T = taus.shape[1]
    M = B * T

    pis, wc, bc, w1, b1, w2, b2, wz, bz = params
    E = pis.shape[-1]
    H = w1.shape[-1]
    AQ = wz.shape[-1]
    assert AQ == action_dim * quantile_len

    vmem_limit, tm_cap = _tpu_budget()
    TM = _choose_row_tile(M, S, E, H, AQ, vmem_limit, tm_cap)
    M_p = _round_up(M, TM)
    num_tiles = M_p // TM

    f32, bf16 = jnp.float32, jnp.bfloat16

    taus_flat = taus.reshape(M, 1).astype(f32)
    # Broadcast the per-batch state row to one row per (batch, tau): this costs
    # M*S*4 bytes of extra HBM traffic but lets every grid step drive the MXU
    # with a full TM-row LHS tile even when T is small.
    state_rows = jnp.broadcast_to(state[:, None, :], (B, T, S)).reshape(M, S).astype(f32)
    if M_p != M:
        pad = M_p - M
        # Padded rows run through the net on zeros (finite values) and are
        # dropped after the kernel.
        taus_flat = jnp.pad(taus_flat, ((0, pad), (0, 0)))
        state_rows = jnp.pad(state_rows, ((0, pad), (0, 0)))

    # bf16 weights for full-rate MXU + half the resident-weight VMEM/DMA bytes;
    # f32 accumulation keeps the error within the stated 2e-2 tolerance.
    pis_f = pis.astype(f32).reshape(1, E)
    wc_b = wc.astype(bf16)
    bc_f = bc.astype(f32).reshape(1, S)
    w1_b = w1.astype(bf16)
    b1_f = b1.astype(f32).reshape(1, H)
    w2_b = w2.astype(bf16)
    b2_f = b2.astype(f32).reshape(1, H)
    wz_b = wz.astype(bf16)
    bz_f = bz.astype(f32).reshape(1, AQ)

    def resident(shape):
        # Constant index_map -> fetched once, VMEM-resident across the grid.
        # TODO(synk): on v7x with large H, pipeline_mode=pl.Buffered(1) would
        # halve the reserved weight VMEM; _choose_row_tile budgets 2x instead.
        return pl.BlockSpec(shape, lambda i: tuple(0 for _ in shape))

    # Cost estimate from the TRUE (unpadded) dims.
    flops = 2 * M * (E * S + S * H + H * H + H * AQ)
    bytes_accessed = (4 * M * (1 + S + AQ)                     # taus + state rows + Z out
                      + 2 * (E * S + S * H + H * H + H * AQ)   # bf16 weights (fetched once)
                      + 4 * (E + S + 2 * H + AQ))               # f32 pis + biases

    z_flat = pl.pallas_call(
        iqn_kernel,
        out_shape=jax.ShapeDtypeStruct((M_p, AQ), f32),
        grid=(num_tiles,),
        in_specs=[
            pl.BlockSpec((TM, 1), lambda i: (i, 0)),    # taus rows
            pl.BlockSpec((TM, S), lambda i: (i, 0)),    # broadcast state rows
            resident((1, E)),                           # pis
            resident((E, S)),                           # cosine_net W (in x out)
            resident((1, S)),                           # cosine_net b
            resident((S, H)),                           # layer1 W
            resident((1, H)),                           # layer1 b
            resident((H, H)),                           # layer2 W
            resident((1, H)),                           # layer2 b
            resident((H, AQ)),                          # Z_value W
            resident((1, AQ)),                          # Z_value b
        ],
        out_specs=pl.BlockSpec((TM, AQ), lambda i: (i, 0)),
        compiler_params=pltpu.CompilerParams(
            dimension_semantics=("parallel",),
            vmem_limit_bytes=vmem_limit),
        cost_estimate=pl.CostEstimate(
            flops=int(flops),
            transcendentals=int(M * E),
            bytes_accessed=int(bytes_accessed)),
    )(taus_flat, state_rows, pis_f, wc_b, bc_f, w1_b, b1_f, w2_b, b2_f, wz_b, bz_f)

    if M_p != M:
        z_flat = z_flat[:M]
    return z_flat.reshape(B, T, action_dim, quantile_len)


def init_params(key, state_dim, action_dim, hidden_dim, quantile_len, embeding_dim):
    """Deterministic synthetic parameters. PyTorch Linear weights are (out, in);
    here they are stored pre-transposed as (in, out) for y = x @ W + b."""
    ks = jax.random.split(key, 8)
    scale = 0.05

    pis = (jnp.pi * jnp.arange(1, embeding_dim + 1, dtype=jnp.float32)).reshape(1, embeding_dim)

    wc = scale * jax.random.normal(ks[0], (embeding_dim, state_dim), jnp.float32)
    bc = scale * jax.random.normal(ks[1], (1, state_dim), jnp.float32)
    w1 = scale * jax.random.normal(ks[2], (state_dim, hidden_dim), jnp.float32)
    b1 = scale * jax.random.normal(ks[3], (1, hidden_dim), jnp.float32)
    w2 = scale * jax.random.normal(ks[4], (hidden_dim, hidden_dim), jnp.float32)
    b2 = scale * jax.random.normal(ks[5], (1, hidden_dim), jnp.float32)
    wz = scale * jax.random.normal(ks[6], (hidden_dim, action_dim * quantile_len), jnp.float32)
    bz = scale * jax.random.normal(ks[7], (1, action_dim * quantile_len), jnp.float32)

    return (pis, wc, bc, w1, b1, w2, b2, wz, bz)


def reference_forward(state, taus, params, *, action_dim, quantile_len):
    """Pure-JAX f32 reference mirroring the PyTorch forward."""
    pis, wc, bc, w1, b1, w2, b2, wz, bz = params
    B = state.shape[0]
    T = taus.shape[1]
    cos = jnp.cos(taus * pis[None, :, :])                 # (B, T, E)
    cos_x = jnp.maximum(cos @ wc + bc, 0.0)               # (B, T, S)
    x = state[:, None, :] * cos_x                         # (B, T, S)
    x = jnp.maximum(x @ w1 + b1, 0.0)
    x = jnp.maximum(x @ w2 + b2, 0.0)
    z = x @ wz + bz
    return z.reshape(B, T, action_dim, quantile_len)


if __name__ == "__main__":
    # Small shapes consistent with the module
    batch = 2
    state_dim = 16
    action_dim = 4
    hidden_dim = 32
    quantile_len = 8
    embeding_dim = 64
    num_tau = 8

    key = jax.random.PRNGKey(0)
    k_state, k_taus, k_params = jax.random.split(key, 3)

    state = jax.random.normal(k_state, (batch, state_dim), jnp.float32)
    taus = jax.random.uniform(k_taus, (batch, num_tau, 1), jnp.float32)

    params = init_params(k_params, state_dim, action_dim, hidden_dim,
                         quantile_len, embeding_dim)

    z = iqn_forward(state, taus, params,
                    action_dim=action_dim, quantile_len=quantile_len)
    z = jax.block_until_ready(z)

    z_ref = reference_forward(state, taus, params,
                              action_dim=action_dim, quantile_len=quantile_len)
    assert z.shape == (batch, num_tau, action_dim, quantile_len)
    # bf16 weights on the MXU (f32 accumulate): intentionally not bit-identical
    # to the f32 reference -> slightly loose tolerance.
    assert jnp.allclose(z, z_ref, atol=2e-2, rtol=2e-2), \
        float(jnp.max(jnp.abs(z - z_ref)))

    print("KERNEL_OK")
</pallas_src>

<mosaic_0001>
module attributes {stable_mosaic.version = 11 : i64} {
  func.func @iqn_kernel(%arg0: i32, %arg1: memref<16x1xf32, #tpu.memory_space<vmem>>, %arg2: memref<16x16xf32, #tpu.memory_space<vmem>>, %arg3: memref<1x64xf32, #tpu.memory_space<vmem>>, %arg4: memref<64x16xbf16, #tpu.memory_space<vmem>>, %arg5: memref<1x16xf32, #tpu.memory_space<vmem>>, %arg6: memref<16x32xbf16, #tpu.memory_space<vmem>>, %arg7: memref<1x32xf32, #tpu.memory_space<vmem>>, %arg8: memref<32x32xbf16, #tpu.memory_space<vmem>>, %arg9: memref<1x32xf32, #tpu.memory_space<vmem>>, %arg10: memref<32x32xbf16, #tpu.memory_space<vmem>>, %arg11: memref<1x32xf32, #tpu.memory_space<vmem>>, %arg12: memref<16x32xf32, #tpu.memory_space<vmem>>) attributes {dimension_semantics = [#tpu.dimension_semantics<parallel>], iteration_bounds = array<i64: 1>, scalar_prefetch = 0 : i64, scratch_operands = 0 : i64, tpu.core_type = #tpu.core_type<tc>, window_params = [{transform_indices = @transform_0, window_bounds = array<i64: 16, 1>}, {transform_indices = @transform_1, window_bounds = array<i64: 16, 16>}, {pipeline_mode = #tpu.pipeline_mode<synchronous>, transform_indices = @transform_2, window_bounds = array<i64: 1, 64>}, {pipeline_mode = #tpu.pipeline_mode<synchronous>, transform_indices = @transform_3, window_bounds = array<i64: 64, 16>}, {pipeline_mode = #tpu.pipeline_mode<synchronous>, transform_indices = @transform_4, window_bounds = array<i64: 1, 16>}, {pipeline_mode = #tpu.pipeline_mode<synchronous>, transform_indices = @transform_5, window_bounds = array<i64: 16, 32>}, {pipeline_mode = #tpu.pipeline_mode<synchronous>, transform_indices = @transform_6, window_bounds = array<i64: 1, 32>}, {pipeline_mode = #tpu.pipeline_mode<synchronous>, transform_indices = @transform_7, window_bounds = array<i64: 32, 32>}, {pipeline_mode = #tpu.pipeline_mode<synchronous>, transform_indices = @transform_8, window_bounds = array<i64: 1, 32>}, {pipeline_mode = #tpu.pipeline_mode<synchronous>, transform_indices = @transform_9, window_bounds = array<i64: 32, 32>}, {pipeline_mode = #tpu.pipeline_mode<synchronous>, transform_indices = @transform_10, window_bounds = array<i64: 1, 32>}, {transform_indices = @transform_11, window_bounds = array<i64: 16, 32>}]} {
    %c0 = arith.constant 0 : index
    %c0_0 = arith.constant 0 : index
    %0 = vector.load %arg1[%c0, %c0_0] : memref<16x1xf32, #tpu.memory_space<vmem>>, vector<16x1xf32>
    %c0_1 = arith.constant 0 : index
    %c0_2 = arith.constant 0 : index
    %1 = vector.load %arg3[%c0_1, %c0_2] : memref<1x64xf32, #tpu.memory_space<vmem>>, vector<1x64xf32>
    %2 = vector.broadcast %0 : vector<16x1xf32> to vector<16x64xf32>
    %3 = vector.broadcast %1 : vector<1x64xf32> to vector<16x64xf32>
    %4 = arith.mulf %2, %3 : vector<16x64xf32>
    %5 = math.cos %4 : vector<16x64xf32>
    %6 = arith.truncf %5 : vector<16x64xf32> to vector<16x64xbf16>
    %c0_3 = arith.constant 0 : index
    %c0_4 = arith.constant 0 : index
    %7 = vector.load %arg4[%c0_3, %c0_4] : memref<64x16xbf16, #tpu.memory_space<vmem>>, vector<64x16xbf16>
    %cst = arith.constant dense<0.000000e+00> : vector<16x16xf32>
    %8 = tpu.matmul %6, %7, %cst {dimension_numbers = #tpu.dot_dimension_numbers<[1], [0], [0], [1], [0, 0, 1, 1], [], []>} : vector<16x64xbf16>, vector<64x16xbf16>, vector<16x16xf32> -> vector<16x16xf32>
    %c0_5 = arith.constant 0 : index
    %c0_6 = arith.constant 0 : index
    %9 = vector.load %arg5[%c0_5, %c0_6] : memref<1x16xf32, #tpu.memory_space<vmem>>, vector<1x16xf32>
    %10 = vector.broadcast %9 : vector<1x16xf32> to vector<16x16xf32>
    %11 = arith.addf %8, %10 : vector<16x16xf32>
    %cst_7 = arith.constant 0.000000e+00 : f32
    %12 = vector.broadcast %cst_7 : f32 to vector<16x16xf32>
    %13 = arith.maximumf %11, %12 : vector<16x16xf32>
    %c0_8 = arith.constant 0 : index
    %c0_9 = arith.constant 0 : index
    %14 = vector.load %arg2[%c0_8, %c0_9] : memref<16x16xf32, #tpu.memory_space<vmem>>, vector<16x16xf32>
    %15 = arith.mulf %14, %13 : vector<16x16xf32>
    %16 = arith.truncf %15 : vector<16x16xf32> to vector<16x16xbf16>
    %c0_10 = arith.constant 0 : index
    %c0_11 = arith.constant 0 : index
    %17 = vector.load %arg6[%c0_10, %c0_11] : memref<16x32xbf16, #tpu.memory_space<vmem>>, vector<16x32xbf16>
    %cst_12 = arith.constant dense<0.000000e+00> : vector<16x32xf32>
    %18 = tpu.matmul %16, %17, %cst_12 {dimension_numbers = #tpu.dot_dimension_numbers<[1], [0], [0], [1], [0, 0, 1, 1], [], []>} : vector<16x16xbf16>, vector<16x32xbf16>, vector<16x32xf32> -> vector<16x32xf32>
    %c0_13 = arith.constant 0 : index
    %c0_14 = arith.constant 0 : index
    %19 = vector.load %arg7[%c0_13, %c0_14] : memref<1x32xf32, #tpu.memory_space<vmem>>, vector<1x32xf32>
    %20 = vector.broadcast %19 : vector<1x32xf32> to vector<16x32xf32>
    %21 = arith.addf %18, %20 : vector<16x32xf32>
    %cst_15 = arith.constant 0.000000e+00 : f32
    %22 = vector.broadcast %cst_15 : f32 to vector<16x32xf32>
    %23 = arith.maximumf %21, %22 : vector<16x32xf32>
    %24 = arith.truncf %23 : vector<16x32xf32> to vector<16x32xbf16>
    %c0_16 = arith.constant 0 : index
    %c0_17 = arith.constant 0 : index
    %25 = vector.load %arg8[%c0_16, %c0_17] : memref<32x32xbf16, #tpu.memory_space<vmem>>, vector<32x32xbf16>
    %cst_18 = arith.constant dense<0.000000e+00> : vector<16x32xf32>
    %26 = tpu.matmul %24, %25, %cst_18 {dimension_numbers = #tpu.dot_dimension_numbers<[1], [0], [0], [1], [0, 0, 1, 1], [], []>} : vector<16x32xbf16>, vector<32x32xbf16>, vector<16x32xf32> -> vector<16x32xf32>
    %c0_19 = arith.constant 0 : index
    %c0_20 = arith.constant 0 : index
    %27 = vector.load %arg9[%c0_19, %c0_20] : memref<1x32xf32, #tpu.memory_space<vmem>>, vector<1x32xf32>
    %28 = vector.broadcast %27 : vector<1x32xf32> to vector<16x32xf32>
    %29 = arith.addf %26, %28 : vector<16x32xf32>
    %cst_21 = arith.constant 0.000000e+00 : f32
    %30 = vector.broadcast %cst_21 : f32 to vector<16x32xf32>
    %31 = arith.maximumf %29, %30 : vector<16x32xf32>
    %32 = arith.truncf %31 : vector<16x32xf32> to vector<16x32xbf16>
    %c0_22 = arith.constant 0 : index
    %c0_23 = arith.constant 0 : index
    %33 = vector.load %arg10[%c0_22, %c0_23] : memref<32x32xbf16, #tpu.memory_space<vmem>>, vector<32x32xbf16>
    %cst_24 = arith.constant dense<0.000000e+00> : vector<16x32xf32>
    %34 = tpu.matmul %32, %33, %cst_24 {dimension_numbers = #tpu.dot_dimension_numbers<[1], [0], [0], [1], [0, 0, 1, 1], [], []>} : vector<16x32xbf16>, vector<32x32xbf16>, vector<16x32xf32> -> vector<16x32xf32>
    %c0_25 = arith.constant 0 : index
    %c0_26 = arith.constant 0 : index
    %35 = vector.load %arg11[%c0_25, %c0_26] : memref<1x32xf32, #tpu.memory_space<vmem>>, vector<1x32xf32>
    %36 = vector.broadcast %35 : vector<1x32xf32> to vector<16x32xf32>
    %37 = arith.addf %34, %36 : vector<16x32xf32>
    %c0_27 = arith.constant 0 : index
    %c0_28 = arith.constant 0 : index
    %38 = vector.load %arg12[%c0_27, %c0_28] : memref<16x32xf32, #tpu.memory_space<vmem>>, vector<16x32xf32>
    tpu.vector_store %arg12[%c0_27, %c0_28], %37 {strides = array<i32>} : memref<16x32xf32, #tpu.memory_space<vmem>>, vector<16x32xf32>,
    return
  }
  func.func @transform_0(%arg0: i32) -> (i32, i32) {
    %c0_i32 = arith.constant 0 : i32
    %c0_i32_0 = arith.constant 0 : i32
    return %arg0, %c0_i32 : i32, i32
  }
  func.func @transform_1(%arg0: i32) -> (i32, i32) {
    %c0_i32 = arith.constant 0 : i32
    %c0_i32_0 = arith.constant 0 : i32
    return %arg0, %c0_i32 : i32, i32
  }
  func.func @transform_2(%arg0: i32) -> (i32, i32) {
    %c0_i32 = arith.constant 0 : i32
    %c0_i32_0 = arith.constant 0 : i32
    %c0_i32_1 = arith.constant 0 : i32
    return %c0_i32, %c0_i32_0 : i32, i32
  }
  func.func @transform_3(%arg0: i32) -> (i32, i32) {
    %c0_i32 = arith.constant 0 : i32
    %c0_i32_0 = arith.constant 0 : i32
    %c0_i32_1 = arith.constant 0 : i32
    return %c0_i32, %c0_i32_0 : i32, i32
  }
  func.func @transform_4(%arg0: i32) -> (i32, i32) {
    %c0_i32 = arith.constant 0 : i32
    %c0_i32_0 = arith.constant 0 : i32
    %c0_i32_1 = arith.constant 0 : i32
    return %c0_i32, %c0_i32_0 : i32, i32
  }
  func.func @transform_5(%arg0: i32) -> (i32, i32) {
    %c0_i32 = arith.constant 0 : i32
    %c0_i32_0 = arith.constant 0 : i32
    %c0_i32_1 = arith.constant 0 : i32
    return %c0_i32, %c0_i32_0 : i32, i32
  }
  func.func @transform_6(%arg0: i32) -> (i32, i32) {
    %c0_i32 = arith.constant 0 : i32
    %c0_i32_0 = arith.constant 0 : i32
    %c0_i32_1 = arith.constant 0 : i32
    return %c0_i32, %c0_i32_0 : i32, i32
  }
  func.func @transform_7(%arg0: i32) -> (i32, i32) {
    %c0_i32 = arith.constant 0 : i32
    %c0_i32_0 = arith.constant 0 : i32
    %c0_i32_1 = arith.constant 0 : i32
    return %c0_i32, %c0_i32_0 : i32, i32
  }
  func.func @transform_8(%arg0: i32) -> (i32, i32) {
    %c0_i32 = arith.constant 0 : i32
    %c0_i32_0 = arith.constant 0 : i32
    %c0_i32_1 = arith.constant 0 : i32
    return %c0_i32, %c0_i32_0 : i32, i32
  }
  func.func @transform_9(%arg0: i32) -> (i32, i32) {
    %c0_i32 = arith.constant 0 : i32
    %c0_i32_0 = arith.constant 0 : i32
    %c0_i32_1 = arith.constant 0 : i32
    return %c0_i32, %c0_i32_0 : i32, i32
  }
  func.func @transform_10(%arg0: i32) -> (i32, i32) {
    %c0_i32 = arith.constant 0 : i32
    %c0_i32_0 = arith.constant 0 : i32
    %c0_i32_1 = arith.constant 0 : i32
    return %c0_i32, %c0_i32_0 : i32, i32
  }
  func.func @transform_11(%arg0: i32) -> (i32, i32) {
    %c0_i32 = arith.constant 0 : i32
    %c0_i32_0 = arith.constant 0 : i32
    return %arg0, %c0_i32 : i32, i32
  }
}

</mosaic_0001>

<bundles_post_ra>
// kernel: tpu_custom_call.1
= control target key start
LH: loop header
LB: loop body
LE: loop exit
PB: predicated region body
PF: predicated region fallthrough
CT: control target
= control target key end

     0   :  { %16 = vsyncpa [#allocation3], 0  ;;  %s1494_s0 = inlined_call_operand.hbm [shape: f32[16,1], index: 0, kind: input, shape index: {}]   ;;  %s1495_s1 = inlined_call_operand.hbm [shape: f32[16,16], index: 1, kind: input, shape index: {}]   ;;  %s1496_s2 = inlined_call_operand.hbm [shape: f32[1,64], index: 2, kind: input, shape index: {}]   ;;  %s1497_s3 = inlined_call_operand.hbm [shape: bf16[64,16], index: 3, kind: input, shape index: {}]   ;;  %s1498_s4 = inlined_call_operand.hbm [shape: f32[1,16], index: 4, kind: input, shape index: {}]   ;;  %s1499_s5 = inlined_call_operand.hbm [shape: bf16[16,32], index: 5, kind: input, shape index: {}]   ;;  %s1500_s6 = inlined_call_operand.hbm [shape: f32[1,32], index: 6, kind: input, shape index: {}]   ;;  %s1501_s7 = inlined_call_operand.hbm [shape: bf16[32,32], index: 7, kind: input, shape index: {}]   ;;  %s1502_s8 = inlined_call_operand.hbm [shape: f32[1,32], index: 8, kind: input, shape index: {}]   ;;  %s1503_s9 = inlined_call_operand.hbm [shape: bf16[32,32], index: 9, kind: input, shape index: {}]   ;;  %s1504_s10 = inlined_call_operand.hbm [shape: f32[1,32], index: 10, kind: input, shape index: {}]   ;;  %s1505_s11 = inlined_call_operand.hbm [shape: f32[16,32], index: 11, kind: output, shape index: {}]  }
   0x1   :  { %17 = vsyncpa [#allocation6], 0 }
   0x2   :  { %18 = vsyncpa [#allocation9], 0 }
   0x3   :  { %19 = vsyncpa [#allocation12], 0 }
   0x4   :  { %20 = vsyncpa [#allocation15], 0 }
   0x5   :  { %21 = vsyncpa [#allocation18], 0 }
   0x6   :  { %22 = vsyncpa [#allocation4], 0  ;;  %s1125_s17 = smov [#allocation5]   ;;  %s1126_s19 = smov [#allocation8]  }
   0x7   :  { %s40_s18 = sshll.u32 %s1125_s17, 4  ;;  %s62_s20 = sshll.u32 %s1126_s19, 4  ;;  %s41_s18 = int_to_ptr.vmem [resolvable:$true] %s40_s18  ;;  %s1210_s20 = int_to_ptr.vmem [resolvable:$true] %s62_s20 }
   0x8   :  { %s847_s23 = scalar_lea.hbm %s1495_s1, 256 }
   0x9   :  { %p848_p0 = scmp.ne.s32.totalorder %s1495_s1, %s847_s23  ;;  %p851_p1 = scmp.lt.u32.totalorder %s847_s23, %s1495_s1 }
   0xb   :  { %p853_p2 = pnand %p851_p1, %p848_p0 }
   0xd   :  { %856 = shalt.err (!%p853_p2)
}
   0xe   :  { %s857_s28 = scalar_lea.vmem %s41_s18, 256  ;;  %p862_p4 = scmp.lt.s32.totalorder %s41_s18, %s41_s18 }
   0xf   :  { %p858_p3 = scmp.ne.s32.totalorder %s41_s18, %s857_s28  ;;  %p863_p5 = scmp.lt.s32.totalorder %s857_s28, %s857_s28 }
  0x11   :  { %p864_p6 = por %p863_p5, %p862_p4 }
  0x13   :  { %p865_p7 = pnand %p864_p6, %p858_p3 }
  0x15   :  { %868 = shalt.err (!%p865_p7)
}
  0x16   :  { %s1127_s29 = smov 128   ;;  %s1128_s30 = smov 8  }
  0x17   :  { %46 = dma.hbm_to_vmem [thread:$0]  %s1495_s1, 256, %s41_s18, [#allocation6], %s1127_s29, %s1127_s29, %s1128_s30  }
  0x18   :  { %s869_s16 = scalar_lea.hbm %s1497_s3, 512 }
  0x19   :  { %p870_p8 = scmp.ne.s32.totalorder %s1497_s3, %s869_s16  ;;  %p873_p9 = scmp.lt.u32.totalorder %s869_s16, %s1497_s3 }
  0x1b   :  { %p875_p10 = pnand %p873_p9, %p870_p8 }
  0x1d   :  { %878 = shalt.err (!%p875_p10)
}
  0x1e   :  { %s879_s23 = scalar_lea.vmem %s1210_s20, 512  ;;  %p884_p12 = scmp.lt.s32.totalorder %s1210_s20, %s1210_s20 }
  0x1f   :  { %p880_p11 = scmp.ne.s32.totalorder %s1210_s20, %s879_s23  ;;  %p885_p13 = scmp.lt.s32.totalorder %s879_s23, %s879_s23 }
  0x21   :  { %p886_p0 = por %p885_p13, %p884_p12 }
  0x23   :  { %p887_p1 = pnand %p886_p0, %p880_p11 }
  0x25   :  { %890 = shalt.err (!%p887_p1)
}
  0x26   :  { %s1129_s1 = smov 64   ;;  %s1130_s18 = smov 4  }
  0x27   :  { %68 = dma.hbm_to_vmem [thread:$0]  %s1497_s3, 512, %s1210_s20, [#allocation9], %s1129_s1, %s1129_s1, %s1130_s18  }
  0x28   :  { %s1131_s26 = smov [#allocation11]   ;;  %s1132_s28 = smov [#allocation14]  }
  0x29   :  { %s84_s27 = sshll.u32 %s1131_s26, 4  ;;  %s106_s12 = sshll.u32 %s1132_s28, 4  ;;  %s85_s27 = int_to_ptr.vmem [resolvable:$true] %s84_s27  ;;  %s1247_s12 = int_to_ptr.vmem [resolvable:$true] %s106_s12 }
  0x2a   :  { %s891_s15 = scalar_lea.hbm %s1499_s5, 128 }
  0x2b   :  { %p892_p2 = scmp.ne.s32.totalorder %s1499_s5, %s891_s15  ;;  %p895_p3 = scmp.lt.u32.totalorder %s891_s15, %s1499_s5 }
  0x2d   :  { %p897_p4 = pnand %p895_p3, %p892_p2 }
  0x2f   :  { %900 = shalt.err (!%p897_p4)
}
  0x30   :  { %s901_s3 = scalar_lea.vmem %s85_s27, 128  ;;  %p906_p6 = scmp.lt.s32.totalorder %s85_s27, %s85_s27 }
  0x31   :  { %p902_p5 = scmp.ne.s32.totalorder %s85_s27, %s901_s3  ;;  %p907_p7 = scmp.lt.s32.totalorder %s901_s3, %s901_s3 }
  0x33   :  { %p908_p8 = por %p907_p7, %p906_p6 }
  0x35   :  { %p909_p9 = pnand %p908_p8, %p902_p5 }
  0x37   :  { %912 = shalt.err (!%p909_p9)
}
  0x38   :  { %90 = dma.hbm_to_vmem [thread:$0]  %s1499_s5, 128, %s85_s27, [#allocation12], %s1129_s1, %s1129_s1, %s1130_s18  }
  0x39   :  { %s913_s25 = scalar_lea.hbm %s1501_s7, 256 }
  0x3a   :  { %p914_p10 = scmp.ne.s32.totalorder %s1501_s7, %s913_s25  ;;  %p917_p11 = scmp.lt.u32.totalorder %s913_s25, %s1501_s7 }
  0x3c   :  { %p919_p12 = pnand %p917_p11, %p914_p10 }
  0x3e   :  { %922 = shalt.err (!%p919_p12)
}
  0x3f   :  { %s923_s15 = scalar_lea.vmem %s1247_s12, 256  ;;  %p928_p0 = scmp.lt.s32.totalorder %s1247_s12, %s1247_s12 }
  0x40   :  { %p924_p13 = scmp.ne.s32.totalorder %s1247_s12, %s923_s15  ;;  %p929_p1 = scmp.lt.s32.totalorder %s923_s15, %s923_s15 }
  0x42   :  { %p930_p2 = por %p929_p1, %p928_p0 }
  0x44   :  { %p931_p3 = pnand %p930_p2, %p924_p13 }
  0x46   :  { %934 = shalt.err (!%p931_p3)
}
  0x47   :  { %112 = dma.hbm_to_vmem [thread:$0]  %s1501_s7, 256, %s1247_s12, [#allocation15], %s1129_s1, %s1129_s1, %s1130_s18  }
  0x48   :  { %s1133_s16 = smov [#allocation17]   ;;  %s1134_s19 = smov [#allocation2]  }
  0x49   :  { %s128_s17 = sshll.u32 %s1133_s16, 4  ;;  %s28_s21 = sshll.u32 %s1134_s19, 4  ;;  %s129_s17 = int_to_ptr.vmem [resolvable:$true] %s128_s17  ;;  %s1284_s21 = int_to_ptr.vmem [resolvable:$true] %s28_s21 }
  0x4a   :  { %s935_s22 = scalar_lea.hbm %s1503_s9, 256 }
  0x4b   :  { %p936_p4 = scmp.ne.s32.totalorder %s1503_s9, %s935_s22  ;;  %p939_p5 = scmp.lt.u32.totalorder %s935_s22, %s1503_s9 }
  0x4d   :  { %p941_p6 = pnand %p939_p5, %p936_p4 }
  0x4f   :  { %944 = shalt.err (!%p941_p6)
}
  0x50   :  { %s945_s7 = scalar_lea.vmem %s129_s17, 256  ;;  %p950_p8 = scmp.lt.s32.totalorder %s129_s17, %s129_s17 }
  0x51   :  { %p946_p7 = scmp.ne.s32.totalorder %s129_s17, %s945_s7  ;;  %p951_p9 = scmp.lt.s32.totalorder %s945_s7, %s945_s7 }
  0x53   :  { %p952_p10 = por %p951_p9, %p950_p8 }
  0x55   :  { %p953_p11 = pnand %p952_p10, %p946_p7 }
  0x57   :  { %956 = shalt.err (!%p953_p11)
}
  0x58   :  { %134 = dma.hbm_to_vmem [thread:$0]  %s1503_s9, 256, %s129_s17, [#allocation18], %s1129_s1, %s1129_s1, %s1130_s18  }
  0x59   :  { %s957_s15 = scalar_lea.hbm %s1494_s0, 256 }
  0x5a   :  { %p958_p12 = scmp.ne.s32.totalorder %s1494_s0, %s957_s15  ;;  %p961_p13 = scmp.lt.u32.totalorder %s957_s15, %s1494_s0 }
  0x5c   :  { %p963_p0 = pnand %p961_p13, %p958_p12 }
  0x5e   :  { %966 = shalt.err (!%p963_p0)
}
  0x5f   :  { %s967_s3 = scalar_lea.vmem %s1284_s21, 256  ;;  %p972_p2 = scmp.lt.s32.totalorder %s1284_s21, %s1284_s21 }
  0x60   :  { %p968_p1 = scmp.ne.s32.totalorder %s1284_s21, %s967_s3  ;;  %p973_p3 = scmp.lt.s32.totalorder %s967_s3, %s967_s3 }
  0x62   :  { %p974_p4 = por %p973_p3, %p972_p2 }
  0x64   :  { %p975_p5 = pnand %p974_p4, %p968_p1 }
  0x66   :  { %978 = shalt.err (!%p975_p5)
}
  0x67   :  { %34 = dma.hbm_to_vmem [thread:$0]  %s1494_s0, 256, %s1284_s21, [#allocation3], %s1127_s29, %s1127_s29, %s1128_s30  }
  0x68   :  { %s1135_s18 = smov [#allocation7]   ;;  %s1136_s20 = smov [#allocation10]  }
  0x69   :  { %s53_s17 = sshll.u32 %s1135_s18, 4  ;;  %s75_s22 = sshll.u32 %s1136_s20, 4  ;;  %s54_s17 = int_to_ptr.vmem [resolvable:$true] %s53_s17  ;;  %s76_s22 = int_to_ptr.vmem [resolvable:$true] %s75_s22 }
  0x6a   :  { %s979_s25 = scalar_lea.hbm %s1496_s2, 16 }
  0x6b   :  { %p980_p6 = scmp.ne.s32.totalorder %s1496_s2, %s979_s25  ;;  %p983_p7 = scmp.lt.u32.totalorder %s979_s25, %s1496_s2 }
  0x6d   :  { %p985_p8 = pnand %p983_p7, %p980_p6 }
  0x6f   :  { %988 = shalt.err (!%p985_p8)
}
  0x70   :  { %s989_s0 = scalar_lea.vmem %s54_s17, 16  ;;  %s993_s21 = scalar_lea.vmem %s54_s17, 32 }
  0x71   :  { %p990_p9 = scmp.ne.s32.totalorder %s54_s17, %s989_s0  ;;  %p994_p10 = scmp.lt.s32.totalorder %s54_s17, %s54_s17 }
  0x72   :  { %p995_p11 = scmp.lt.s32.totalorder %s993_s21, %s989_s0 }
  0x74   :  { %p996_p12 = por %p995_p11, %p994_p10 }
  0x76   :  { %p997_p13 = pnand %p996_p12, %p990_p9 }
  0x78   :  { %1000 = shalt.err (!%p997_p13)
}
  0x79   :  { %56 = dma.hbm_to_vmem [thread:$0]  %s1496_s2, 16, %s54_s17, [#allocation6]  }
  0x7a   :  { %s1001_s27 = scalar_lea.hbm %s1498_s4, 16 }
  0x7b   :  { %p1002_p0 = scmp.ne.s32.totalorder %s1498_s4, %s1001_s27  ;;  %p1005_p1 = scmp.lt.u32.totalorder %s1001_s27, %s1498_s4 }
  0x7d   :  { %p1007_p2 = pnand %p1005_p1, %p1002_p0 }
  0x7f   :  { %1010 = shalt.err (!%p1007_p2)
}
  0x80   :  { %s1011_s1 = scalar_lea.vmem %s76_s22, 16  ;;  %s1015_s18 = scalar_lea.vmem %s76_s22, 32 }
  0x81   :  { %p1012_p3 = scmp.ne.s32.totalorder %s76_s22, %s1011_s1  ;;  %p1016_p4 = scmp.lt.s32.totalorder %s76_s22, %s76_s22 }
  0x82   :  { %p1017_p5 = scmp.lt.s32.totalorder %s1015_s18, %s1011_s1 }
  0x84   :  { %p1018_p6 = por %p1017_p5, %p1016_p4 }
  0x86   :  { %p1019_p7 = pnand %p1018_p6, %p1012_p3 }
  0x88   :  { %1022 = shalt.err (!%p1019_p7)
}
  0x89   :  { %78 = dma.hbm_to_vmem [thread:$0]  %s1498_s4, 16, %s76_s22, [#allocation9]  }
  0x8a   :  { %s1137_s20 = smov [#allocation13]   ;;  %s1138_s24 = smov [#allocation16]  }
  0x8b   :  { %s97_s23 = sshll.u32 %s1137_s20, 4  ;;  %s119_s25 = sshll.u32 %s1138_s24, 4  ;;  %s98_s23 = int_to_ptr.vmem [resolvable:$true] %s97_s23  ;;  %s120_s25 = int_to_ptr.vmem [resolvable:$true] %s119_s25 }
  0x8c   :  { %s1023_s12 = scalar_lea.hbm %s1500_s6, 16 }
  0x8d   :  { %p1024_p8 = scmp.ne.s32.totalorder %s1500_s6, %s1023_s12  ;;  %p1027_p9 = scmp.lt.u32.totalorder %s1023_s12, %s1500_s6 }
  0x8f   :  { %p1029_p10 = pnand %p1027_p9, %p1024_p8 }
  0x91   :  { %1032 = shalt.err (!%p1029_p10)
}
  0x92   :  { %s1033_s4 = scalar_lea.vmem %s98_s23, 16  ;;  %s1037_s22 = scalar_lea.vmem %s98_s23, 32 }
  0x93   :  { %p1034_p11 = scmp.ne.s32.totalorder %s98_s23, %s1033_s4  ;;  %p1038_p12 = scmp.lt.s32.totalorder %s98_s23, %s98_s23 }
  0x94   :  { %p1039_p13 = scmp.lt.s32.totalorder %s1037_s22, %s1033_s4 }
  0x96   :  { %p1040_p0 = por %p1039_p13, %p1038_p12 }
  0x98   :  { %p1041_p1 = pnand %p1040_p0, %p1034_p11 }
  0x9a   :  { %1044 = shalt.err (!%p1041_p1)
}
  0x9b   :  { %100 = dma.hbm_to_vmem [thread:$0]  %s1500_s6, 16, %s98_s23, [#allocation12]  }
  0x9c   :  { %s1045_s16 = scalar_lea.hbm %s1502_s8, 16 }
  0x9d   :  { %p1046_p2 = scmp.ne.s32.totalorder %s1502_s8, %s1045_s16  ;;  %p1049_p3 = scmp.lt.u32.totalorder %s1045_s16, %s1502_s8 }
  0x9f   :  { %p1051_p4 = pnand %p1049_p3, %p1046_p2 }
  0xa1   :  { %1054 = shalt.err (!%p1051_p4)
}
  0xa2   :  { %s1055_s18 = scalar_lea.vmem %s120_s25, 16  ;;  %s1059_s2 = scalar_lea.vmem %s120_s25, 32 }
  0xa3   :  { %p1056_p5 = scmp.ne.s32.totalorder %s120_s25, %s1055_s18  ;;  %p1060_p6 = scmp.lt.s32.totalorder %s120_s25, %s120_s25 }
  0xa4   :  { %p1061_p7 = scmp.lt.s32.totalorder %s1059_s2, %s1055_s18 }
  0xa6   :  { %p1062_p8 = por %p1061_p7, %p1060_p6 }
  0xa8   :  { %p1063_p9 = pnand %p1062_p8, %p1056_p5 }
  0xaa   :  { %1066 = shalt.err (!%p1063_p9)
}
  0xab   :  { %122 = dma.hbm_to_vmem [thread:$0]  %s1502_s8, 16, %s120_s25, [#allocation15]  }
  0xac   :  { %s1139_s20 = smov [#allocation19]   ;;  %s1067_s7 = scalar_lea.hbm %s1504_s10, 16 }
  0xad   :  { %s141_s23 = sshll.u32 %s1139_s20, 4  ;;  %p1068_p10 = scmp.ne.s32.totalorder %s1504_s10, %s1067_s7  ;;  %s142_s23 = int_to_ptr.vmem [resolvable:$true] %s141_s23 }
  0xae   :  { %p1071_p11 = scmp.lt.u32.totalorder %s1067_s7, %s1504_s10 }
  0xb0   :  { %p1073_p12 = pnand %p1071_p11, %p1068_p10 }
  0xb2   :  { %1076 = shalt.err (!%p1073_p12)
}
  0xb3   :  { %s1077_s13 = scalar_lea.vmem %s142_s23, 16  ;;  %s1081_s8 = scalar_lea.vmem %s142_s23, 32 }
  0xb4   :  { %p1078_p13 = scmp.ne.s32.totalorder %s142_s23, %s1077_s13  ;;  %p1082_p0 = scmp.lt.s32.totalorder %s142_s23, %s142_s23 }
  0xb5   :  { %p1083_p1 = scmp.lt.s32.totalorder %s1081_s8, %s1077_s13 }
  0xb7   :  { %p1084_p2 = por %p1083_p1, %p1082_p0 }
  0xb9   :  { %p1085_p3 = pnand %p1084_p2, %p1078_p13 }
  0xbb   :  { %1088 = shalt.err (!%p1085_p3)
}
  0xbc   :  { %144 = dma.hbm_to_vmem [thread:$0]  %s1504_s10, 16, %s142_s23, [#allocation18]  }
  0xbd   :  { %1111 = dma.done.wait [#allocation3], 256  }
  0xbe   :  { %1112 = vsyncadd [#allocation3], 4294967040 }
  0xbf   :  { %1113 = dma.done.wait [#allocation6], 272  }
  0xc0   :  { %1114 = vsyncadd [#allocation6], 4294967024 }
  0xc1   :  { %1115 = dma.done.wait [#allocation9], 528  }
  0xc2   :  { %1116 = vsyncadd [#allocation9], 4294966768 }
  0xc3   :  { %1117 = dma.done.wait [#allocation12], 144  }
  0xc4   :  { %1118 = vsyncadd [#allocation12], 4294967152 }
  0xc5   :  { %1119 = dma.done.wait [#allocation15], 272  }
  0xc6   :  { %1120 = vsyncadd [#allocation15], 4294967024 }
  0xc7   :  { %1121 = dma.done.wait [#allocation18], 272  }
  0xc8   :  { %1122 = vsyncadd [#allocation18], 4294967024  ;;  %v1140_v0 = vmov 0   ;;  %v179_v1 = vld [vmem:[#allocation2] sm:$0xff]  ;;  %v180_v2 = vld [vmem:[#allocation2 + $0x8] sm:$0xff]  ;;  %v1141_v4 = vmov 0.0  }
  0xc9   :  { %829 = vset.pattern.permute.xlu0 %v1140_v0  ;;  %v830_v3 = vld [vmem:[#allocation8] sm:$0xff]   ;;  %762 = vmatprep.subr.bf16.mxu0 %v1141_v4  ;;  %vm1142_vm0 = vmmov 0   ;;  %v831_v5 = vld [vmem:[#allocation8 + $0x8] sm:$0xff]   ;;  %v832_v6 = vld [vmem:[#allocation8 + $0x10] sm:$0xff]   ;;  %v1143_v29 = vmov 683565275  }
  0xca   :  { %184 = vperm.xlu0 %829, %v179_v1   ;;  %770 = vmatprep.mubr.msk.bf16.mxu0 %vm1142_vm0, %v1141_v4  ;;  %v833_v7 = vld [vmem:[#allocation8 + $0x18] sm:$0xff]   ;;  %v1144_v33 = vmov 2475754826   ;;  %v1145_v35 = vmov 2131351028   ;;  %s1149_s10 = smov [#allocation20]  }
  0xcb   :  { %763 = vmatpush3.bf16.msra.mxu0 %v830_v3  ;;  %774 = vmatprep.subr.bf16.mxu1 %v1141_v4  ;;  %v723_v8 = vld [vmem:[#allocation7] ss:$0 sm:$0xff]  ;;  %v1146_v37 = vmov 2102212464   ;;  %v1147_v39 = vmov 920167782  }
  0xcc   :  { %764 = vmatprep.subr.bf16.mxu0 %v1141_v4  ;;  %776 = vmatprep.mubr.msk.bf16.mxu1 %vm1142_vm0, %v1141_v4  ;;  %v1148_v46 = vmov 1326507024   ;;  %s706_s22 = sshll.u32 %s1149_s10, 4  ;;  %s707_s22 = int_to_ptr.vmem [resolvable:$true] %s706_s22 }
  0xcd   :  { %s1089_s14 = scalar_lea.vmem %s707_s22, 256  ;;  %p1094_p5 = scmp.lt.s32.totalorder %s707_s22, %s707_s22 }
  0xce   :  { %189 = vperm.xlu0 %829, %v180_v2   ;;  %p1090_p4 = scmp.ne.s32.totalorder %s707_s22, %s1089_s14  ;;  %p1095_p6 = scmp.lt.s32.totalorder %s1089_s14, %s1089_s14 }
  0xcf   :  { %765 = vmatpush3.bf16.msra.mxu0 %v831_v5 }
  0xd0   :  { %766 = vmatprep.subr.bf16.mxu0 %v1141_v4  ;;  %p1096_p7 = por %p1095_p6, %p1094_p5 }
  0xd2   :  { %p1097_p8 = pnand %p1096_p7, %p1090_p4 }
  0xd3   :  { %767 = vmatpush3.bf16.msra.mxu0 %v832_v6 }
  0xd4   :  { %768 = vmatprep.subr.bf16.mxu0 %v1141_v4 }
  0xd7   :  { %769 = vmatpush3.bf16.msra.mxu0 %v833_v7 }
 0x149   :  { %v185_v9 = vpop.permute.xlu0 %184 }
 0x14a   :  { %v1390_v10 = vmul.f32 %v723_v8, %v185_v9 }
 0x14c   :  { %v200_v11 = vand.u32 2147483647, %v1390_v10  ;;  %v203_v12 = vand.u32 2139095040, %v1390_v10  ;;  %vm202_vm15 = vcmp.lt.s32.totalorder %v1390_v10, 0 }
 0x14d   :  { %v190_v13 = vpop.permute.xlu0 %189 }
 0x14e   :  { %v204_v14 = vshrl.u32 %v203_v12, 23  ;;  %v1394_v15 = vmul.f32 %v723_v8, %v190_v13  ;;  %v207_v16 = vand.u32 8388607, %v200_v11 }
 0x150   :  { %v724_v17 = vadd.s32 4294967169, %v204_v14  ;;  %v306_v18 = vand.u32 2139095040, %v1394_v15  ;;  %v208_v20 = vor.u32 8388608, %v207_v16  ;;  %v303_v22 = vand.u32 2147483647, %v1394_v15 }
 0x152   :  { %v210_v19 = vadd.s32 1, %v724_v17  ;;  %v307_v21 = vshrl.u32 %v306_v18, 23  ;;  %v1400_v27 = vshll.u32 %v208_v20, 8  ;;  %v310_v31 = vand.u32 8388607, %v303_v22 }
 0x154   :  { %vm211_vm1 = vcmp.gt.s32.totalorder %v210_v19, 0  ;;  %v728_v24 = vadd.s32 4294967169, %v307_v21  ;;  %v311_v61 = vor.u32 8388608, %v310_v31 }
 0x155   :  { %v212_v23 = vsel %vm211_vm1, %v210_v19, 0  ;;  %vm1448_vm1 = vcmp.le.f32.partialorder %v200_v11, 0.7853982 }
 0x156   :  { %v213_v25 = vshrl.u32 %v212_v23, 5  ;;  %v214_v26 = vand.u32 31, %v212_v23  ;;  %v313_v32 = vadd.s32 1, %v728_v24  ;;  %v351_v13 = vshll.u32 %v311_v61, 8 }
 0x158   :  { %v215_v28 = vsub.s32 32, %v214_v26  ;;  %v217_v30 = vshll.u32 %v1143_v29, %v214_v26  ;;  %v220_v34 = vshll.u32 %v1144_v33, %v214_v26  ;;  %v223_v36 = vshll.u32 %v1145_v35, %v214_v26 }
 0x159   :  { %v226_v38 = vshll.u32 %v1146_v37, %v214_v26  ;;  %v229_v40 = vshll.u32 %v1147_v39, %v214_v26  ;;  %vm232_vm2 = vcmp.lt.s32.totalorder %v213_v25, 1  ;;  %vm234_vm3 = vcmp.lt.s32.totalorder %v213_v25, 3 }
 0x15a   :  { %v218_v41 = vshrl.u32 %v1144_v33, %v215_v28  ;;  %v221_v42 = vshrl.u32 %v1145_v35, %v215_v28  ;;  %v224_v43 = vshrl.u32 %v1146_v37, %v215_v28  ;;  %v216_v44 = vshrl.u32 %v1143_v29, %v215_v28 }
 0x15b   :  { %v227_v45 = vshrl.u32 %v1147_v39, %v215_v28  ;;  %v230_v47 = vshrl.u32 %v1148_v46, %v215_v28  ;;  %vm314_vm4 = vcmp.gt.s32.totalorder %v313_v32, 0  ;;  %vm235_vm5 = vcmp.lt.s32.totalorder %v213_v25, 4 }
 0x15c   :  { %v219_v48 = vor.u32 %v218_v41, %v217_v30  ;;  %v222_v49 = vor.u32 %v221_v42, %v220_v34  ;;  %v225_v50 = vor.u32 %v224_v43, %v223_v36  ;;  %v315_v53 = vsel %vm314_vm4, %v313_v32, 0 }
 0x15d   :  { %v228_v51 = vor.u32 %v227_v45, %v226_v38  ;;  %v231_v52 = vor.u32 %v230_v47, %v229_v40  ;;  %vm233_vm6 = vcmp.lt.s32.totalorder %v213_v25, 2  ;;  %v317_v0 = vand.u32 31, %v315_v53 }
 0x15e   :  { %v236_v54 = vsel %vm232_vm2, %v216_v44, %v219_v48  ;;  %v237_v55 = vsel %vm235_vm5, %v225_v50, 2102212464  ;;  %v240_v56 = vsel %vm232_vm2, %v219_v48, %v222_v49  ;;  %v244_v57 = vsel %vm232_vm2, %v222_v49, %v225_v50 }
 0x15f   :  { %v238_v58 = vsel %vm234_vm3, %v222_v49, %v237_v55  ;;  %v241_v59 = vsel %vm235_vm5, %v228_v51, 920167782  ;;  %v245_v60 = vsel %vm235_vm5, %v231_v52, 1326507024  ;;  %v316_v9 = vshrl.u32 %v315_v53, 5 }
 0x160   :  { %v242_v62 = vsel %vm234_vm3, %v225_v50, %v241_v59  ;;  %v246_v63 = vsel %vm234_vm3, %v228_v51, %v245_v60  ;;  %v239_v1 = vsel %vm233_vm6, %v236_v54, %v238_v58  ;;  %v318_v12 = vsub.s32 32, %v317_v0 }
 0x161   :  { %v243_v2 = vsel %vm233_vm6, %v240_v56, %v242_v62  ;;  %v247_v3 = vsel %vm233_vm6, %v244_v57, %v246_v63  ;;  %v255_v14 = vmul.u32 %v1400_v27, %v239_v1  ;;  %v320_v16 = vshll.u32 %v1143_v29, %v317_v0 }
 0x162   :  { %v1413_v5 = vmul.u32.u64.low %v1400_v27, %v247_v3  ;;  %v1414_v6 = vmul.u32.u64.high %v1400_v27, %v247_v3, %v1413_v5  ;;  %v1417_v7 = vmul.u32.u64.low %v1400_v27, %v243_v2  ;;  %v1418_v8 = vmul.u32.u64.high %v1400_v27, %v243_v2, %v1417_v7 }
 0x163   :  { %v323_v17 = vshll.u32 %v1144_v33, %v317_v0  ;;  %v326_v18 = vshll.u32 %v1145_v35, %v317_v0  ;;  %v321_v19 = vshrl.u32 %v1144_v33, %v318_v12  ;;  %v324_v20 = vshrl.u32 %v1145_v35, %v318_v12 }
 0x164   :  { %v327_v21 = vshrl.u32 %v1146_v37, %v318_v12  ;;  %v329_v23 = vshll.u32 %v1146_v37, %v317_v0  ;;  %vm257_vm7 = vc.u32 %v1414_v6, %v1417_v7  ;;  %v258_v24 = vadd.s32 1, %v1418_v8 }
 0x165   :  { %v330_v25 = vshrl.u32 %v1147_v39, %v318_v12  ;;  %v332_v26 = vshll.u32 %v1147_v39, %v317_v0  ;;  %v322_v28 = vor.u32 %v321_v19, %v320_v16  ;;  %v325_v30 = vor.u32 %v324_v20, %v323_v17 }
 0x166   :  { %v328_v31 = vor.u32 %v327_v21, %v326_v18  ;;  %v333_v32 = vshrl.u32 %v1148_v46, %v318_v12  ;;  %v259_v27 = vsel %vm257_vm7, %v258_v24, %v1418_v8  ;;  %vm335_vm8 = vcmp.lt.s32.totalorder %v316_v9, 1 }
 0x167   :  { %v331_v34 = vor.u32 %v330_v25, %v329_v23  ;;  %vm338_vm9 = vcmp.lt.s32.totalorder %v316_v9, 4  ;;  %v260_v33 = vadd.s32 %v259_v27, %v255_v14  ;;  %vm337_vm10 = vcmp.lt.s32.totalorder %v316_v9, 3 }
 0x168   :  { %v334_v35 = vor.u32 %v333_v32, %v332_v26  ;;  %v340_v36 = vsel %vm338_vm9, %v328_v31, 2102212464  ;;  %v319_v37 = vshrl.u32 %v1143_v29, %v318_v12  ;;  %v343_v38 = vsel %vm335_vm8, %v322_v28, %v325_v30 }
 0x169   :  { %v344_v40 = vsel %vm338_vm9, %v331_v34, 920167782  ;;  %v347_v41 = vsel %vm335_vm8, %v325_v30, %v328_v31  ;;  %v261_v42 = vadd.s32 536870912, %v260_v33  ;;  %vm336_vm11 = vcmp.lt.s32.totalorder %v316_v9, 2 }
 0x16a   :  { %v345_v39 = vsel %vm337_vm10, %v328_v31, %v344_v40  ;;  %v348_v43 = vsel %vm338_vm9, %v334_v35, 1326507024  ;;  %v339_v44 = vsel %vm335_vm8, %v319_v37, %v322_v28  ;;  %v341_v45 = vsel %vm337_vm10, %v325_v30, %v340_v36  ;;  %v837_v36 = vld [vmem:[#allocation17] sm:$0xff]  }
 0x16b   :  { %v346_v46 = vsel %vm336_vm11, %v343_v38, %v345_v39  ;;  %v349_v47 = vsel %vm337_vm10, %v331_v34, %v348_v43  ;;  %v1428_v48 = vshrl.u32 %v261_v42, 30  ;;  %v342_v54 = vsel %vm336_vm11, %v339_v44, %v341_v45 }
 0x16c   :  { %v350_v49 = vsel %vm336_vm11, %v347_v41, %v349_v47  ;;  %v1430_v50 = vmul.u32.u64.low %v351_v13, %v346_v46  ;;  %v1431_v51 = vmul.u32.u64.high %v351_v13, %v346_v46, %v1430_v50  ;;  %v358_v57 = vmul.u32 %v351_v13, %v342_v54 }
 0x16d   :  { %v1433_v52 = vmul.u32.u64.low %v351_v13, %v350_v49  ;;  %v1434_v53 = vmul.u32.u64.high %v351_v13, %v350_v49, %v1433_v52  ;;  %v263_v29 = vshll.u32 %v1428_v48, 30  ;;  %v256_v8 = vadd.s32 %v1417_v7, %v1414_v6 }
 0x16e   :  { %v361_v56 = vadd.s32 1, %v1431_v51  ;;  %v286_v44 = vsub.s32 4, %v1428_v48  ;;  %vm305_vm2 = vcmp.lt.s32.totalorder %v1394_v15, 0  ;;  %vm304_vm3 = vcmp.le.f32.partialorder %v303_v22, 0.7853982 }
 0x16f   :  { %v264_v55 = vsub.s32 %v260_v33, %v263_v29  ;;  %vm360_vm12 = vc.u32 %v1434_v53, %v1430_v50  ;;  %v359_v31 = vadd.s32 %v1430_v50, %v1434_v53  ;;  %vm292_vm10 = vweird.f32 %v1390_v10 }
 0x170   :  { %v362_v59 = vsel %vm360_vm12, %v361_v56, %v1431_v51  ;;  %v287_v47 = vsel %vm202_vm15, %v286_v44, %v1428_v48  ;;  %vm395_vm11 = vweird.f32 %v1394_v15  ;;  %vm446_vm12 = vcmask 523264  }
 0x171   :  { %v266_v58 = vsub.s32 0, %v264_v55  ;;  %v363_v60 = vadd.s32 %v362_v59, %v358_v57  ;;  %v289_v51 = vsel %vm1448_vm1, 0, %v287_v47  ;;  %v745_v47 = vld [vmem:[#allocation19] ss:$0 sm:$0xff] }
 0x172   :  { %v293_v54 = vand.u32 3, %v289_v51 }
 0x173   :  { %v725_v61 = vmin.u32 %v266_v58, %v264_v55  ;;  %v364_v62 = vadd.s32 536870912, %v363_v60 }
 0x174   :  { %vm295_vm4 = vcmp.eq.s32.totalorder %v293_v54, 0  ;;  %vm298_vm5 = vcmp.eq.s32.totalorder %v293_v54, 2  ;;  %vm294_vm6 = vcmp.lt.s32.totalorder %v293_v54, 2 }
 0x175   :  { %v268_v63 = vclz %v725_v61  ;;  %v365_v0 = vshrl.u32 %v364_v62, 30 }
 0x177   :  { %v726_v1 = vadd.s32 4294967294, %v268_v63  ;;  %v366_v2 = vshll.u32 %v365_v0, 30  ;;  %v389_v46 = vsub.s32 4, %v365_v0 }
 0x179   :  { %vm727_vm13 = vcmp.lt.s32.totalorder %v726_v1, 0  ;;  %v367_v5 = vsub.s32 %v363_v60, %v366_v2  ;;  %v390_v52 = vsel %vm305_vm2, %v389_v46, %v365_v0 }
 0x17a   :  { %v271_v3 = vsel %vm727_vm13, 0, %v726_v1  ;;  %v392_v29 = vsel %vm304_vm3, 0, %v390_v52  ;;  %vm513_vm13 = vcmask 130048  }
 0x17b   :  { %v272_v9 = vsub.s32 32, %v271_v3  ;;  %v276_v12 = vsub.s32 4294967266, %v271_v3  ;;  %v369_v13 = vsub.s32 0, %v367_v5  ;;  %v273_v14 = vshll.u32 %v264_v55, %v271_v3 }
 0x17c   :  { %v396_v56 = vand.u32 3, %v392_v29 }
 0x17d   :  { %v274_v16 = vshrl.u32 %v256_v8, %v272_v9  ;;  %v277_v17 = vadd.s32 127, %v276_v12  ;;  %v729_v18 = vmin.u32 %v369_v13, %v367_v5  ;;  %v834_v8 = vld [vmem:[#allocation11] sm:$0xff]   ;;  %v732_v9 = vld [vmem:[#allocation10] ss:$0 sm:$0xff] }
 0x17e   :  { %vm401_vm7 = vcmp.eq.s32.totalorder %v396_v56, 2  ;;  %vm398_vm8 = vcmp.eq.s32.totalorder %v396_v56, 0  ;;  %vm397_vm9 = vcmp.lt.s32.totalorder %v396_v56, 2  ;;  %775 = vmatpush3.bf16.msra.mxu1 %v834_v8 }
 0x17f   :  { %v275_v19 = vor.u32 %v274_v16, %v273_v14  ;;  %v278_v20 = vshll.u32 %v277_v17, 23  ;;  %v371_v21 = vclz %v729_v18  ;;  %780 = vmatprep.subr.bf16.mxu1 %v1141_v4 }
 0x181   :  { %v279_v23 = vor.u32 4788187, %v278_v20  ;;  %v730_v24 = vadd.s32 4294967294, %v371_v21  ;;  %v282_v26 = vcvt.s32.f32 %v275_v19  ;;  %v493_v19 = vld [vmem:[#allocation5] sm:$0xff] }
 0x183   :  { %v280_v25 = vand.u32 2147483647, %v279_v23  ;;  %vm731_vm14 = vcmp.lt.s32.totalorder %v730_v24, 0 }
 0x184   :  { %v374_v30 = vsel %vm731_vm14, 0, %v730_v24  ;;  %vm584_vm14 = vcmask 261120  }
 0x185   :  { %v283_v28 = vmul.f32 %v282_v26, %v280_v25  ;;  %v375_v6 = vsub.s32 32, %v374_v30  ;;  %v379_v7 = vsub.s32 4294967266, %v374_v30  ;;  %v376_v27 = vshll.u32 %v367_v5, %v374_v30  ;;  %v835_v25 = vld [vmem:[#allocation14] sm:$0xff]   ;;  %v836_v26 = vld [vmem:[#allocation14 + $0x8] sm:$0xff]  }
 0x187   :  { %v284_v32 = vxor.u32 2147483648, %v283_v28  ;;  %v377_v34 = vshrl.u32 %v359_v31, %v375_v6  ;;  %v380_v33 = vadd.s32 127, %v379_v7 }
 0x189   :  { %v285_v35 = vsel %vm202_vm15, %v284_v32, %v283_v28  ;;  %v378_v37 = vor.u32 %v377_v34, %v376_v27  ;;  %v381_v38 = vshll.u32 %v380_v33, 23  ;;  %v738_v28 = vld [vmem:[#allocation13] ss:$0 sm:$0xff] }
 0x18a   :  { %v288_v40 = vsel %vm1448_vm1, %v1390_v10, %v285_v35 }
 0x18b   :  { %v382_v41 = vor.u32 4788187, %v381_v38  ;;  %839 = vcosq.f32 %v288_v40  ;;  %v385_v39 = vcvt.s32.f32 %v378_v37  ;;  %v838_v37 = vld [vmem:[#allocation17 + $0x8] sm:$0xff]   ;;  %v741_v38 = vld [vmem:[#allocation16] ss:$0 sm:$0xff] }
 0x18c   :  { %841 = vsinq.f32 %v288_v40 }
 0x18d   :  { %v383_v42 = vand.u32 2147483647, %v382_v41 }
 0x18f   :  { %v386_v43 = vmul.f32 %v385_v39, %v383_v42 }
 0x191   :  { %v387_v45 = vxor.u32 2147483648, %v386_v43 }
 0x193   :  { %v388_v11 = vsel %vm305_vm2, %v387_v45, %v386_v43 }
 0x194   :  { %v391_v49 = vsel %vm304_vm3, %v1394_v15, %v388_v11  ;;  %v494_v15 = vld [vmem:[#allocation5 + $0x8] sm:$0xff] }
 0x195   :  { %843 = vcosq.f32 %v391_v49  ;;  %v840_v50 = vpop.eup %839 }
 0x196   :  { %845 = vsinq.f32 %v391_v49  ;;  %v842_v53 = vpop.eup %841  ;;  %v299_v22 = vxor.u32 2147483648, %v840_v50 }
 0x197   :  { %v296_v55 = vxor.u32 2147483648, %v842_v53 }
 0x198   :  { %v300_v48 = vsel %vm298_vm5, %v299_v22, %v842_v53 }
 0x199   :  { %v297_v58 = vsel %vm295_vm4, %v840_v50, %v296_v55 }
 0x19a   :  { %v301_v62 = vsel %vm294_vm6, %v297_v58, %v300_v48 }
 0x19b   :  { %v302_v2 = vsel %vm292_vm10, nan, %v301_v62 }
 0x19f   :  { %v844_v57 = vpop.eup %843 }
 0x1a0   :  { %v846_v59 = vpop.eup %845  ;;  %v402_v60 = vxor.u32 2147483648, %v844_v57 }
 0x1a1   :  { %v399_v61 = vxor.u32 2147483648, %v846_v59 }
 0x1a2   :  { %v403_v63 = vsel %vm401_vm7, %v402_v60, %v846_v59 }
 0x1a3   :  { %v400_v0 = vsel %vm398_vm8, %v844_v57, %v399_v61 }
 0x1a4   :  { %v404_v1 = vsel %vm397_vm9, %v400_v0, %v403_v63 }
 0x1a5   :  { %v405_v3 = vsel %vm395_vm11, nan, %v404_v1 }
 0x1a6   :  { %v406_v5 = vpack.c.bf16 %v405_v3, %v302_v2 }
 0x1a8   :  { %771 = vmatmul.mubr.msk.bf16.vlgmr.msra.gmra.mrb[0].mxu0 %vm446_vm12, %v406_v5 }
 0x27b   :  { %v484_v12 = vpop.f32.mrb[0].mxu0 }
 0x27c   :  { %v485_v13 = vadd.f32 %v732_v9, %v484_v12  ;;  %v772_v14 = vpop.f32.mrb[1].mxu0 }
 0x27d   :  { %v487_v16 = vpop.f32.mrb[2].mxu0 }
 0x27e   :  { %v491_v17 = vmax.f32 %v485_v13, 0.0  ;;  %v488_v18 = vadd.f32 %v732_v9, %v487_v16  ;;  %v773_v10 = vpop.f32.mrb[3].mxu0 }
 0x280   :  { %v492_v20 = vmax.f32 %v488_v18, 0.0  ;;  %v495_v21 = vmul.f32 %v493_v19, %v491_v17 }
 0x282   :  { %v496_v23 = vmul.f32 %v494_v15, %v492_v20 }
 0x284   :  { %v497_v24 = vpack.c.bf16 %v496_v23, %v495_v21 }
 0x286   :  { %777 = vmatmul.mubr.msk.bf16.vlgmr.msra.gmra.mrb[0].mxu1 %vm513_vm13, %v497_v24 }
 0x287   :  { %784 = vmatprep.mubr.msk.bf16.mxu1 %vm1142_vm0, %v1141_v4  ;;  %781 = vmatpush3.bf16.msra.mxu1 %v835_v25 }
 0x288   :  { %782 = vmatprep.subr.bf16.mxu1 %v1141_v4 }
 0x28b   :  { %783 = vmatpush3.bf16.msra.mxu1 %v836_v26 }
 0x28c   :  { %788 = vmatprep.subr.bf16.mxu1 %v1141_v4 }
 0x359   :  { %v551_v30 = vpop.f32.mrb[0].mxu1 }
 0x35a   :  { %v552_v31 = vadd.f32 %v738_v28, %v551_v30  ;;  %v778_v6 = vpop.f32.mrb[1].mxu1 }
 0x35b   :  { %v554_v7 = vpop.f32.mrb[2].mxu1 }
 0x35c   :  { %v555_v32 = vadd.f32 %v738_v28, %v554_v7  ;;  %v779_v27 = vpop.f32.mrb[3].mxu1  ;;  %v558_v34 = vmax.f32 %v552_v31, 0.0 }
 0x35e   :  { %v559_v33 = vmax.f32 %v555_v32, 0.0 }
 0x360   :  { %v560_v35 = vpack.c.bf16 %v559_v33, %v558_v34 }
 0x362   :  { %785 = vmatmul.mubr.msk.bf16.vlgmr.msra.gmra.mrb[4].mxu1 %vm584_vm14, %v560_v35 }
 0x363   :  { %792 = vmatprep.mubr.msk.bf16.mxu1 %vm1142_vm0, %v1141_v4  ;;  %789 = vmatpush3.bf16.msra.mxu1 %v837_v36 }
 0x364   :  { %790 = vmatprep.subr.bf16.mxu1 %v1141_v4 }
 0x367   :  { %791 = vmatpush3.bf16.msra.mxu1 %v838_v37 }
 0x435   :  { %v622_v40 = vpop.f32.mrb[4].mxu1 }
 0x436   :  { %v623_v41 = vadd.f32 %v741_v38, %v622_v40  ;;  %v786_v42 = vpop.f32.mrb[5].mxu1 }
 0x437   :  { %v625_v39 = vpop.f32.mrb[6].mxu1 }
 0x438   :  { %v626_v43 = vadd.f32 %v741_v38, %v625_v39  ;;  %v787_v44 = vpop.f32.mrb[7].mxu1  ;;  %v629_v45 = vmax.f32 %v623_v41, 0.0 }
 0x43a   :  { %v630_v11 = vmax.f32 %v626_v43, 0.0 }
 0x43c   :  { %v631_v46 = vpack.c.bf16 %v630_v11, %v629_v45 }
 0x43e   :  { %793 = vmatmul.mubr.msk.bf16.vlgmr.msra.gmra.mrb[8].mxu1 %vm584_vm14, %v631_v46 }
 0x511   :  { %v692_v49 = vpop.f32.mrb[8].mxu1 }
 0x512   :  { %v693_v50 = vadd.f32 %v745_v47, %v692_v49  ;;  %v794_v4 = vpop.f32.mrb[9].mxu1 }
 0x513   :  { %v695_v51 = vpop.f32.mrb[10].mxu1 }
 0x514   :  { %699 = vst.msk [vmem:[#allocation20] sm:$0xff] %vm584_vm14, %v693_v50  ;;  %v696_v52 = vadd.f32 %v745_v47, %v695_v51  ;;  %v795_v53 = vpop.f32.mrb[11].mxu1 }
 0x516   :  { %700 = vst.msk [vmem:[#allocation20 + $0x8] sm:$0xff] %vm584_vm14, %v696_v52 }
 0x517   :  { %1100 = shalt.err (!%p1097_p8)
}
 0x518   :  { %s1101_s27 = scalar_lea.hbm %s1505_s11, 256 }
 0x519   :  { %p1102_p9 = scmp.ne.s32.totalorder %s1505_s11, %s1101_s27  ;;  %p1105_p10 = scmp.lt.u32.totalorder %s1101_s27, %s1505_s11 }
 0x51b   :  { %p1107_p11 = pnand %p1105_p10, %p1102_p9 }
 0x51d   :  { %1110 = shalt.err (!%p1107_p11)
}
 0x51e   :  { %712 = dma.vmem_to_hbm [thread:$0]  %s707_s22, 256, %s1505_s11, [#allocation4], %s1127_s29, %s1127_s29, %s1128_s30  }
 0x51f   :  { %1123 = dma.done.wait [#allocation4], 256  }
 0x520   :  { %1124 = vsyncadd [#allocation4], 4294967040 }
 0x521   :  { %716 = vsyncpa [#allocation3], 1 }
 0x522   :  { %717 = vsyncpa [#allocation6], 1 }
 0x523   :  { %718 = vsyncpa [#allocation9], 1 }
 0x524   :  { %719 = vsyncpa [#allocation12], 1 }
 0x525   :  { %720 = vsyncpa [#allocation15], 1 }
 0x526   :  { %721 = vsyncpa [#allocation18], 1 }
 0x527   :  { %722 = vsyncpa [#allocation4], 1 }

</bundles_post_ra>
